<compile_context>
chip_gen: v7x
topology: tpu7x:2x2x1
jax: 0.10.0
libtpu: 0.0.40
codegen_flags: <defaults>
</compile_context>

<pallas_src>
import functools

import jax
import jax.numpy as jnp
from jax.experimental import pallas as pl
from jax.experimental.pallas import tpu as pltpu

LN_EPS = 1e-5  # PyTorch nn.LayerNorm default


def _mixed_attention_kernel(bb, T, Nt,
                            x_ref, xf_ref, sm_ref, tc_ref,
                            gx_ref, bx_ref, gt_ref, bt_ref,
                            wx_ref, bx3_ref, wt_ref, bt2_ref,
                            hm_ref, idh_ref, ihd_ref,
                            o_ref):
    """One grid step == `bb` batch elements, row-flattened."""
    f32 = jnp.float32
    bf16 = jnp.bfloat16

    x = x_ref[...]      # (bb*T, D)   motion tokens (flat, f32)
    xf = xf_ref[...]    # (bb*Nt, L)  text tokens   (flat, f32)
    sm = sm_ref[...]    # (bb*T, 1)   src_mask      (flat)
    tc = tc_ref[...]    # (bb*Nt, 1)  text_cond * row-valid (flat)

    D = x.shape[-1]

    def layernorm(v, g, b):
        mu = jnp.mean(v, axis=-1, keepdims=True)
        var = jnp.mean((v - mu) ** 2, axis=-1, keepdims=True)
        return (v - mu) * jax.lax.rsqrt(var + LN_EPS) * g + b

    # LayerNorm in f32, then cast to bf16 for the MXU (f32 accumulation).
    nx = layernorm(x, gx_ref[...], bx_ref[...]).astype(bf16)     # (bb*T, D)
    nxf = layernorm(xf, gt_ref[...], bt_ref[...]).astype(bf16)   # (bb*Nt, L)

    # ---- Fused projections: one lane-dense bf16 MXU matmul per source -------
    # px = [q | key_motion | value_motion],  pt = [key_text | value_text]
    px = jnp.dot(nx, wx_ref[...], preferred_element_type=f32) + bx3_ref[...]   # (bb*T, 3D)
    pt = jnp.dot(nxf, wt_ref[...], preferred_element_type=f32) + bt2_ref[...]  # (bb*Nt, 2D)

    # NOTE: these lane slices are only free views when D % 128 == 0; pad D in
    # production (tiny relayout at the test size D=32).
    q = px[:, :D]                                    # (bb*T, D)
    km = px[:, D:2 * D] + (1.0 - sm) * (-1000000.0)  # masked motion keys
    vm = px[:, 2 * D:] * sm                          # masked motion values
    kt = pt[:, :D] + (1.0 - tc) * (-1000000.0)       # masked text keys
    vt = pt[:, D:] * tc                              # masked text values

    # ---- Per-head query softmax ---------------------------------------------
    # Row-global max is per-head shift-invariant; the denominator is computed
    # with two thin block-indicator matmuls (rows*2*D*H MACs, not rows*D*D)
    # and clamped so a fully-underflowed head cannot produce inf/NaN.
    q = q - jnp.max(q, axis=-1, keepdims=True)
    eq = jnp.exp(q)                                                    # (bb*T, D)
    qsum_h = jnp.dot(eq, idh_ref[...], preferred_element_type=f32)     # (bb*T, H)
    qden = jnp.dot(qsum_h, ihd_ref[...], preferred_element_type=f32)   # (bb*T, D)
    q_soft = eq * pl.reciprocal(jnp.maximum(qden, 1e-37), approx=True)

    # ---- Key softmax over the sequence axis (text + motion, no concat) ------
    kt_b = kt.reshape(bb, Nt, D)
    km_b = km.reshape(bb, T, D)
    vt_b = vt.reshape(bb, Nt, D)
    vm_b = vm.reshape(bb, T, D)

    kmax = jnp.maximum(jnp.max(kt_b, axis=1), jnp.max(km_b, axis=1))[:, None, :]
    ekt = jnp.exp(kt_b - kmax)                        # (bb, Nt, D)
    ekm = jnp.exp(km_b - kmax)                        # (bb, T, D)
    kden = jnp.sum(ekt, axis=1) + jnp.sum(ekm, axis=1)          # (bb, D), >= 1
    krecip = pl.reciprocal(kden, approx=True)[:, None, :]       # (bb, 1, D)
    # Fold the normalization into the (smaller) key tensors instead of a full
    # elementwise pass over the (bb, D, D) attention matrix.
    ekt = (ekt * krecip).astype(bf16)
    ekm = (ekm * krecip).astype(bf16)
    # TODO(synk): nn.Dropout on the key softmax omitted (eval-mode / p=0).

    # ---- attention[b, d, l] = sum_n key_soft[b, n, d] * value[b, n, l] ------
    att = (jnp.einsum('bnd,bnl->bdl', ekt, vt_b.astype(bf16),
                      preferred_element_type=f32)
           + jnp.einsum('bnd,bnl->bdl', ekm, vm_b.astype(bf16),
                        preferred_element_type=f32))
    # Block-diagonal head mask (precomputed on host, VMEM-resident).
    att = (att * hm_ref[...][None, :, :]).astype(bf16)           # (bb, D, D)

    # ---- y[b, t, l] = sum_d q_soft[b, t, d] * att[b, d, l] ------------------
    q_b = q_soft.astype(bf16).reshape(bb, T, D)
    y = jnp.einsum('btd,bdl->btl', q_b, att, preferred_element_type=f32)

    # Residual (proj_out is None); lane-dense flat store.
    o_ref[...] = x + y.reshape(bb * T, D)


def _pick_block_b(B, Tp, Np, D, L, budget_bytes=16 * 1024 * 1024):
    """Largest divisor of B fitting the per-step VMEM budget, capped so the
    grid keeps >= 2 steps (v7x has 2 TensorCores; a 1-step grid idles one).
    Budget is conservative for v7x's 64 MiB VMEM; on v5e/v6e (128 MiB) a
    larger budget / vmem_limit can be used for better per-step amortization."""
    per_batch = 4 * (
        2 * 2 * (2 * Tp * D + Np * L + Tp + Np)   # double-buffered x/out/xf/masks
        + 3 * Tp * D + 2 * Np * D                 # fused projection outputs
        + 6 * (Tp + Np) * D                       # softmax / scaled / bf16 temps
        + 3 * D * D)                              # att (f32 + bf16) + mask product
    fixed = 4 * (3 * D * D // 2 + L * D + D * D + 5 * D + 2 * L + 2 * D)
    best = 1
    for bb in range(1, B + 1):
        if B % bb == 0 and fixed + bb * per_batch <= budget_bytes:
            best = bb
    if B >= 2:
        best = min(best, B // 2)
        while B % best != 0:
            best -= 1
    return max(best, 1)


def prepare_params(params, latent_dim, num_heads, compute_dtype=jnp.bfloat16):
    """One-time (outside the hot path) weight fusion, bf16 cast and constant
    head-mask / head-indicator construction."""
    D, H = latent_dim, num_heads
    hd = D // H
    heads = jnp.arange(D) // hd
    fused = dict(params)
    fused["wx"] = jnp.concatenate(
        [params["wq"], params["wkm"], params["wvm"]], axis=1).astype(compute_dtype)
    fused["bx3"] = jnp.concatenate(
        [params["bq"], params["bkm"], params["bvm"]], axis=1).astype(jnp.float32)
    fused["wt"] = jnp.concatenate(
        [params["wkt"], params["wvt"]], axis=1).astype(compute_dtype)
    fused["bt2"] = jnp.concatenate(
        [params["bkt"], params["bvt"]], axis=1).astype(jnp.float32)
    fused["head_mask"] = (heads[:, None] == heads[None, :]).astype(jnp.float32)
    fused["ind_dh"] = (heads[:, None] == jnp.arange(H)[None, :]).astype(jnp.float32)
    fused["ind_hd"] = jnp.transpose(fused["ind_dh"])
    return fused


def efficient_mixed_attention(x, xf, src_mask, cond_type, fused_params, num_heads,
                              block_b=None):
    B, T, D = x.shape
    Nt, L = xf.shape[1], xf.shape[2]
    H = num_heads
    assert D % H == 0, "latent_dim must be divisible by num_heads"

    f32 = jnp.float32

    # Pad sequence lengths to sublane multiples of 8 (instead of a block_b=B
    # fallback).  Padded motion rows get src_mask=0, padded text rows get
    # text_cond=0, so they contribute nothing to keys/values; their (garbage)
    # query rows are sliced off at the end.
    Tp = -(-T // 8) * 8
    Np = -(-Nt // 8) * 8

    sm = src_mask.reshape(B, T).astype(f32)
    tc = (jnp.mod(cond_type.reshape(B), 10) > 0).astype(f32)

    if Tp != T:
        x_p = jnp.concatenate([x.astype(f32), jnp.zeros((B, Tp - T, D), f32)], axis=1)
        sm_p = jnp.concatenate([sm, jnp.zeros((B, Tp - T), f32)], axis=1)
    else:
        x_p, sm_p = x.astype(f32), sm
    if Np != Nt:
        xf_p = jnp.concatenate([xf.astype(f32), jnp.zeros((B, Np - Nt, L), f32)], axis=1)
    else:
        xf_p = xf.astype(f32)

    text_valid = (jnp.arange(Np) < Nt).astype(f32)        # per-row validity
    tc_rows = tc[:, None] * text_valid[None, :]           # (B, Np)

    x_flat = x_p.reshape(B * Tp, D)
    xf_flat = xf_p.reshape(B * Np, L)
    sm_flat = sm_p.reshape(B * Tp, 1)
    tc_flat = tc_rows.reshape(B * Np, 1)

    if block_b is None:
        block_b = _pick_block_b(B, Tp, Np, D, L)
    assert B % block_b == 0
    grid = (B // block_b,)

    in_specs = [
        pl.BlockSpec((block_b * Tp, D), lambda b: (b, 0)),    # x (flat)
        pl.BlockSpec((block_b * Np, L), lambda b: (b, 0)),    # xf (flat)
        pl.BlockSpec((block_b * Tp, 1), lambda b: (b, 0)),    # src_mask (flat)
        pl.BlockSpec((block_b * Np, 1), lambda b: (b, 0)),    # text cond (flat)
        pl.BlockSpec((1, D), lambda b: (0, 0)),               # LN gamma (motion)
        pl.BlockSpec((1, D), lambda b: (0, 0)),               # LN beta  (motion)
        pl.BlockSpec((1, L), lambda b: (0, 0)),               # LN gamma (text)
        pl.BlockSpec((1, L), lambda b: (0, 0)),               # LN beta  (text)
        pl.BlockSpec((D, 3 * D), lambda b: (0, 0)),           # fused motion W (bf16)
        pl.BlockSpec((1, 3 * D), lambda b: (0, 0)),           # fused motion b
        pl.BlockSpec((L, 2 * D), lambda b: (0, 0)),           # fused text W (bf16)
        pl.BlockSpec((1, 2 * D), lambda b: (0, 0)),           # fused text b
        pl.BlockSpec((D, D), lambda b: (0, 0)),               # head_mask
        pl.BlockSpec((D, H), lambda b: (0, 0)),               # head indicator (D, H)
        pl.BlockSpec((H, D), lambda b: (0, 0)),               # head indicator (H, D)
    ]
    out_spec = pl.BlockSpec((block_b * Tp, D), lambda b: (b, 0))

    kernel = functools.partial(_mixed_attention_kernel, block_b, Tp, Np)
    y_flat = pl.pallas_call(
        kernel,
        out_shape=jax.ShapeDtypeStruct((B * Tp, D), f32),
        grid=grid,
        in_specs=in_specs,
        out_specs=out_spec,
        compiler_params=pltpu.CompilerParams(
            dimension_semantics=("parallel",),
            # <= ~48 MiB keeps headroom on v7x (64 MiB VMEM); v5e/v6e (128 MiB)
            # tolerate a larger limit + block_b for more per-step amortization.
            vmem_limit_bytes=48 << 20),
    )(x_flat, xf_flat, sm_flat, tc_flat,
      fused_params["gx"], fused_params["bx"], fused_params["gt"], fused_params["bt"],
      fused_params["wx"], fused_params["bx3"], fused_params["wt"], fused_params["bt2"],
      fused_params["head_mask"], fused_params["ind_dh"], fused_params["ind_hd"])
    return y_flat.reshape(B, Tp, D)[:, :T, :]


def reference(x, xf, src_mask, cond_type, params, num_heads):
    """Pure-JAX mirror of the PyTorch forward (for validation)."""
    B, T, D = x.shape
    Nt = xf.shape[1]
    H = num_heads
    N = Nt + T

    def ln(v, g, b):
        mu = v.mean(-1, keepdims=True)
        var = ((v - mu) ** 2).mean(-1, keepdims=True)
        return (v - mu) / jnp.sqrt(var + LN_EPS) * g.reshape(-1) + b.reshape(-1)

    nx = ln(x, params["gx"], params["bx"])
    nxf = ln(xf, params["gt"], params["bt"])
    tc = (jnp.mod(cond_type, 10) > 0).astype(jnp.float32).reshape(B, 1, 1)
    sm = src_mask.reshape(B, T, 1).astype(jnp.float32)

    q = nx @ params["wq"] + params["bq"].reshape(-1)
    kt = nxf @ params["wkt"] + params["bkt"].reshape(-1) + (1 - tc) * -1000000.0
    km = nx @ params["wkm"] + params["bkm"].reshape(-1) + (1 - sm) * -1000000.0
    key = jnp.concatenate([kt, km], axis=1)

    q = jax.nn.softmax(q.reshape(B, T, H, -1), axis=-1)
    key = jax.nn.softmax(key.reshape(B, N, H, -1), axis=1)

    vt = (nxf @ params["wvt"] + params["bvt"].reshape(-1)) * tc
    vm = (nx @ params["wvm"] + params["bvm"].reshape(-1)) * sm
    value = jnp.concatenate([vt, vm], axis=1).reshape(B, N, H, -1)

    attention = jnp.einsum('bnhd,bnhl->bhdl', key, value)
    y = jnp.einsum('bnhd,bhdl->bnhl', q, attention).reshape(B, T, D)
    return x + y


def init_params(key, D, L):
    ks = jax.random.split(key, 14)
    s = 0.05
    n = lambda k, shape: s * jax.random.normal(k, shape, jnp.float32)
    return {
        "gx": 1.0 + 0.1 * jax.random.normal(ks[10], (1, D), jnp.float32),
        "bx": 0.1 * jax.random.normal(ks[11], (1, D), jnp.float32),
        "gt": 1.0 + 0.1 * jax.random.normal(ks[12], (1, L), jnp.float32),
        "bt": 0.1 * jax.random.normal(ks[13], (1, L), jnp.float32),
        "wq": n(ks[0], (D, D)),  "bq": n(ks[1], (1, D)),
        "wkt": n(ks[2], (L, D)), "bkt": n(ks[3], (1, D)),
        "wvt": n(ks[4], (L, D)), "bvt": n(ks[5], (1, D)),
        "wkm": n(ks[6], (D, D)), "bkm": n(ks[7], (1, D)),
        "wvm": n(ks[8], (D, D)), "bvm": n(ks[9], (1, D)),
    }


if __name__ == "__main__":
    B, T, D = 2, 8, 32
    Nt, L = 8, 32
    H = 4

    root = jax.random.PRNGKey(0)
    k_x, k_xf, k_mask, k_params = jax.random.split(root, 4)

    x = jax.random.normal(k_x, (B, T, D), jnp.float32)
    xf = jax.random.normal(k_xf, (B, Nt, L), jnp.float32)
    src_mask = (jax.random.uniform(k_mask, (B, T)) > 0.3).astype(jnp.float32)
    cond_type = jnp.array([[[1]], [[10]]], dtype=jnp.int32)  # one text-cond, one not
    params = init_params(k_params, D, L)
    fused = prepare_params(params, D, H)   # one-time fusion / bf16 cast (outside hot path)

    out = efficient_mixed_attention(x, xf, src_mask, cond_type, fused, H)
    out = jax.block_until_ready(out)

    # Full-f32 reference for validation.
    with jax.default_matmul_precision("highest"):
        ref = jax.block_until_ready(reference(x, xf, src_mask, cond_type, params, H))

    assert out.shape == (B, T, D)
    # Kernel uses bf16 MXU operands + approx reciprocal (per perf review), so
    # compare against the f32 reference at bf16-level tolerance.
    assert jnp.allclose(out, ref, atol=1e-2, rtol=1e-2), (
        f"max abs err = {jnp.max(jnp.abs(out - ref))}")

    print("KERNEL_OK")
</pallas_src>

<mosaic_0001>
module attributes {stable_mosaic.version = 11 : i64} {
  func.func @_mixed_attention_kernel(%arg0: i32, %arg1: memref<8x32xf32, #tpu.memory_space<vmem>>, %arg2: memref<8x32xf32, #tpu.memory_space<vmem>>, %arg3: memref<8x1xf32, #tpu.memory_space<vmem>>, %arg4: memref<8x1xf32, #tpu.memory_space<vmem>>, %arg5: memref<1x32xf32, #tpu.memory_space<vmem>>, %arg6: memref<1x32xf32, #tpu.memory_space<vmem>>, %arg7: memref<1x32xf32, #tpu.memory_space<vmem>>, %arg8: memref<1x32xf32, #tpu.memory_space<vmem>>, %arg9: memref<32x96xbf16, #tpu.memory_space<vmem>>, %arg10: memref<1x96xf32, #tpu.memory_space<vmem>>, %arg11: memref<32x64xbf16, #tpu.memory_space<vmem>>, %arg12: memref<1x64xf32, #tpu.memory_space<vmem>>, %arg13: memref<32x32xf32, #tpu.memory_space<vmem>>, %arg14: memref<32x4xf32, #tpu.memory_space<vmem>>, %arg15: memref<4x32xf32, #tpu.memory_space<vmem>>, %arg16: memref<8x32xf32, #tpu.memory_space<vmem>>) attributes {dimension_semantics = [#tpu.dimension_semantics<parallel>], iteration_bounds = array<i64: 2>, scalar_prefetch = 0 : i64, scratch_operands = 0 : i64, tpu.core_type = #tpu.core_type<tc>, window_params = [{transform_indices = @transform_0, window_bounds = array<i64: 8, 32>}, {transform_indices = @transform_1, window_bounds = array<i64: 8, 32>}, {transform_indices = @transform_2, window_bounds = array<i64: 8, 1>}, {transform_indices = @transform_3, window_bounds = array<i64: 8, 1>}, {pipeline_mode = #tpu.pipeline_mode<synchronous>, transform_indices = @transform_4, window_bounds = array<i64: 1, 32>}, {pipeline_mode = #tpu.pipeline_mode<synchronous>, transform_indices = @transform_5, window_bounds = array<i64: 1, 32>}, {pipeline_mode = #tpu.pipeline_mode<synchronous>, transform_indices = @transform_6, window_bounds = array<i64: 1, 32>}, {pipeline_mode = #tpu.pipeline_mode<synchronous>, transform_indices = @transform_7, window_bounds = array<i64: 1, 32>}, {pipeline_mode = #tpu.pipeline_mode<synchronous>, transform_indices = @transform_8, window_bounds = array<i64: 32, 96>}, {pipeline_mode = #tpu.pipeline_mode<synchronous>, transform_indices = @transform_9, window_bounds = array<i64: 1, 96>}, {pipeline_mode = #tpu.pipeline_mode<synchronous>, transform_indices = @transform_10, window_bounds = array<i64: 32, 64>}, {pipeline_mode = #tpu.pipeline_mode<synchronous>, transform_indices = @transform_11, window_bounds = array<i64: 1, 64>}, {pipeline_mode = #tpu.pipeline_mode<synchronous>, transform_indices = @transform_12, window_bounds = array<i64: 32, 32>}, {pipeline_mode = #tpu.pipeline_mode<synchronous>, transform_indices = @transform_13, window_bounds = array<i64: 32, 4>}, {pipeline_mode = #tpu.pipeline_mode<synchronous>, transform_indices = @transform_14, window_bounds = array<i64: 4, 32>}, {transform_indices = @transform_15, window_bounds = array<i64: 8, 32>}]} {
    %c0 = arith.constant 0 : index
    %c0_0 = arith.constant 0 : index
    %0 = vector.load %arg1[%c0, %c0_0] : memref<8x32xf32, #tpu.memory_space<vmem>>, vector<8x32xf32>
    %c0_1 = arith.constant 0 : index
    %c0_2 = arith.constant 0 : index
    %1 = vector.load %arg2[%c0_1, %c0_2] : memref<8x32xf32, #tpu.memory_space<vmem>>, vector<8x32xf32>
    %c0_3 = arith.constant 0 : index
    %c0_4 = arith.constant 0 : index
    %2 = vector.load %arg3[%c0_3, %c0_4] : memref<8x1xf32, #tpu.memory_space<vmem>>, vector<8x1xf32>
    %c0_5 = arith.constant 0 : index
    %c0_6 = arith.constant 0 : index
    %3 = vector.load %arg4[%c0_5, %c0_6] : memref<8x1xf32, #tpu.memory_space<vmem>>, vector<8x1xf32>
    %c0_7 = arith.constant 0 : index
    %c0_8 = arith.constant 0 : index
    %4 = vector.load %arg5[%c0_7, %c0_8] : memref<1x32xf32, #tpu.memory_space<vmem>>, vector<1x32xf32>
    %c0_9 = arith.constant 0 : index
    %c0_10 = arith.constant 0 : index
    %5 = vector.load %arg6[%c0_9, %c0_10] : memref<1x32xf32, #tpu.memory_space<vmem>>, vector<1x32xf32>
    %cst = arith.constant dense<0.000000e+00> : vector<8xf32>
    %6 = vector.multi_reduction <add>, %0, %cst [1] : vector<8x32xf32> to vector<8xf32>
    %7 = vector.shape_cast %6 : vector<8xf32> to vector<8x1xf32>
    %cst_11 = arith.constant 3.200000e+01 : f32
    %8 = vector.broadcast %cst_11 : f32 to vector<8x1xf32>
    %9 = arith.divf %7, %8 : vector<8x1xf32>
    %10 = vector.broadcast %9 : vector<8x1xf32> to vector<8x32xf32>
    %11 = arith.subf %0, %10 : vector<8x32xf32>
    %12 = arith.mulf %11, %11 : vector<8x32xf32>
    %cst_12 = arith.constant dense<0.000000e+00> : vector<8xf32>
    %13 = vector.multi_reduction <add>, %12, %cst_12 [1] : vector<8x32xf32> to vector<8xf32>
    %14 = vector.shape_cast %13 : vector<8xf32> to vector<8x1xf32>
    %cst_13 = arith.constant 3.200000e+01 : f32
    %15 = vector.broadcast %cst_13 : f32 to vector<8x1xf32>
    %16 = arith.divf %14, %15 : vector<8x1xf32>
    %17 = vector.broadcast %9 : vector<8x1xf32> to vector<8x32xf32>
    %18 = arith.subf %0, %17 : vector<8x32xf32>
    %cst_14 = arith.constant 9.99999974E-6 : f32
    %19 = vector.broadcast %cst_14 : f32 to vector<8x1xf32>
    %20 = arith.addf %16, %19 : vector<8x1xf32>
    %21 = math.rsqrt %20 : vector<8x1xf32>
    %22 = vector.broadcast %21 : vector<8x1xf32> to vector<8x32xf32>
    %23 = arith.mulf %18, %22 : vector<8x32xf32>
    %24 = vector.broadcast %4 : vector<1x32xf32> to vector<8x32xf32>
    %25 = arith.mulf %23, %24 : vector<8x32xf32>
    %26 = vector.broadcast %5 : vector<1x32xf32> to vector<8x32xf32>
    %27 = arith.addf %25, %26 : vector<8x32xf32>
    %28 = arith.truncf %27 : vector<8x32xf32> to vector<8x32xbf16>
    %c0_15 = arith.constant 0 : index
    %c0_16 = arith.constant 0 : index
    %29 = vector.load %arg7[%c0_15, %c0_16] : memref<1x32xf32, #tpu.memory_space<vmem>>, vector<1x32xf32>
    %c0_17 = arith.constant 0 : index
    %c0_18 = arith.constant 0 : index
    %30 = vector.load %arg8[%c0_17, %c0_18] : memref<1x32xf32, #tpu.memory_space<vmem>>, vector<1x32xf32>
    %cst_19 = arith.constant dense<0.000000e+00> : vector<8xf32>
    %31 = vector.multi_reduction <add>, %1, %cst_19 [1] : vector<8x32xf32> to vector<8xf32>
    %32 = vector.shape_cast %31 : vector<8xf32> to vector<8x1xf32>
    %cst_20 = arith.constant 3.200000e+01 : f32
    %33 = vector.broadcast %cst_20 : f32 to vector<8x1xf32>
    %34 = arith.divf %32, %33 : vector<8x1xf32>
    %35 = vector.broadcast %34 : vector<8x1xf32> to vector<8x32xf32>
    %36 = arith.subf %1, %35 : vector<8x32xf32>
    %37 = arith.mulf %36, %36 : vector<8x32xf32>
    %cst_21 = arith.constant dense<0.000000e+00> : vector<8xf32>
    %38 = vector.multi_reduction <add>, %37, %cst_21 [1] : vector<8x32xf32> to vector<8xf32>
    %39 = vector.shape_cast %38 : vector<8xf32> to vector<8x1xf32>
    %cst_22 = arith.constant 3.200000e+01 : f32
    %40 = vector.broadcast %cst_22 : f32 to vector<8x1xf32>
    %41 = arith.divf %39, %40 : vector<8x1xf32>
    %42 = vector.broadcast %34 : vector<8x1xf32> to vector<8x32xf32>
    %43 = arith.subf %1, %42 : vector<8x32xf32>
    %cst_23 = arith.constant 9.99999974E-6 : f32
    %44 = vector.broadcast %cst_23 : f32 to vector<8x1xf32>
    %45 = arith.addf %41, %44 : vector<8x1xf32>
    %46 = math.rsqrt %45 : vector<8x1xf32>
    %47 = vector.broadcast %46 : vector<8x1xf32> to vector<8x32xf32>
    %48 = arith.mulf %43, %47 : vector<8x32xf32>
    %49 = vector.broadcast %29 : vector<1x32xf32> to vector<8x32xf32>
    %50 = arith.mulf %48, %49 : vector<8x32xf32>
    %51 = vector.broadcast %30 : vector<1x32xf32> to vector<8x32xf32>
    %52 = arith.addf %50, %51 : vector<8x32xf32>
    %53 = arith.truncf %52 : vector<8x32xf32> to vector<8x32xbf16>
    %c0_24 = arith.constant 0 : index
    %c0_25 = arith.constant 0 : index
    %54 = vector.load %arg9[%c0_24, %c0_25] : memref<32x96xbf16, #tpu.memory_space<vmem>>, vector<32x96xbf16>
    %cst_26 = arith.constant dense<0.000000e+00> : vector<8x96xf32>
    %55 = tpu.matmul %28, %54, %cst_26 {dimension_numbers = #tpu.dot_dimension_numbers<[1], [0], [0], [1], [0, 0, 1, 1], [], []>} : vector<8x32xbf16>, vector<32x96xbf16>, vector<8x96xf32> -> vector<8x96xf32>
    %c0_27 = arith.constant 0 : index
    %c0_28 = arith.constant 0 : index
    %56 = vector.load %arg10[%c0_27, %c0_28] : memref<1x96xf32, #tpu.memory_space<vmem>>, vector<1x96xf32>
    %57 = vector.broadcast %56 : vector<1x96xf32> to vector<8x96xf32>
    %58 = arith.addf %55, %57 : vector<8x96xf32>
    %c0_29 = arith.constant 0 : index
    %c0_30 = arith.constant 0 : index
    %59 = vector.load %arg11[%c0_29, %c0_30] : memref<32x64xbf16, #tpu.memory_space<vmem>>, vector<32x64xbf16>
    %cst_31 = arith.constant dense<0.000000e+00> : vector<8x64xf32>
    %60 = tpu.matmul %53, %59, %cst_31 {dimension_numbers = #tpu.dot_dimension_numbers<[1], [0], [0], [1], [0, 0, 1, 1], [], []>} : vector<8x32xbf16>, vector<32x64xbf16>, vector<8x64xf32> -> vector<8x64xf32>
    %c0_32 = arith.constant 0 : index
    %c0_33 = arith.constant 0 : index
    %61 = vector.load %arg12[%c0_32, %c0_33] : memref<1x64xf32, #tpu.memory_space<vmem>>, vector<1x64xf32>
    %62 = vector.broadcast %61 : vector<1x64xf32> to vector<8x64xf32>
    %63 = arith.addf %60, %62 : vector<8x64xf32>
    %64 = vector.extract_strided_slice %58 {offsets = [0, 0], sizes = [8, 32], strides = [1, 1]} : vector<8x96xf32> to vector<8x32xf32>
    %65 = vector.extract_strided_slice %58 {offsets = [0, 32], sizes = [8, 32], strides = [1, 1]} : vector<8x96xf32> to vector<8x32xf32>
    %cst_34 = arith.constant 1.000000e+00 : f32
    %66 = vector.broadcast %cst_34 : f32 to vector<8x1xf32>
    %67 = arith.subf %66, %2 : vector<8x1xf32>
    %cst_35 = arith.constant -1.000000e+06 : f32
    %68 = vector.broadcast %cst_35 : f32 to vector<8x1xf32>
    %69 = arith.mulf %67, %68 : vector<8x1xf32>
    %70 = vector.broadcast %69 : vector<8x1xf32> to vector<8x32xf32>
    %71 = arith.addf %65, %70 : vector<8x32xf32>
    %72 = vector.extract_strided_slice %58 {offsets = [0, 64], sizes = [8, 32], strides = [1, 1]} : vector<8x96xf32> to vector<8x32xf32>
    %73 = vector.broadcast %2 : vector<8x1xf32> to vector<8x32xf32>
    %74 = arith.mulf %72, %73 : vector<8x32xf32>
    %75 = vector.extract_strided_slice %63 {offsets = [0, 0], sizes = [8, 32], strides = [1, 1]} : vector<8x64xf32> to vector<8x32xf32>
    %cst_36 = arith.constant 1.000000e+00 : f32
    %76 = vector.broadcast %cst_36 : f32 to vector<8x1xf32>
    %77 = arith.subf %76, %3 : vector<8x1xf32>
    %cst_37 = arith.constant -1.000000e+06 : f32
    %78 = vector.broadcast %cst_37 : f32 to vector<8x1xf32>
    %79 = arith.mulf %77, %78 : vector<8x1xf32>
    %80 = vector.broadcast %79 : vector<8x1xf32> to vector<8x32xf32>
    %81 = arith.addf %75, %80 : vector<8x32xf32>
    %82 = vector.extract_strided_slice %63 {offsets = [0, 32], sizes = [8, 32], strides = [1, 1]} : vector<8x64xf32> to vector<8x32xf32>
    %83 = vector.broadcast %3 : vector<8x1xf32> to vector<8x32xf32>
    %84 = arith.mulf %82, %83 : vector<8x32xf32>
    %cst_38 = arith.constant dense<0xFF800000> : vector<8xf32>
    %85 = vector.multi_reduction <maximumf>, %64, %cst_38 [1] : vector<8x32xf32> to vector<8xf32>
    %86 = vector.shape_cast %85 : vector<8xf32> to vector<8x1xf32>
    %87 = vector.broadcast %86 : vector<8x1xf32> to vector<8x32xf32>
    %88 = arith.subf %64, %87 : vector<8x32xf32>
    %89 = math.exp %88 : vector<8x32xf32>
    %c0_39 = arith.constant 0 : index
    %c0_40 = arith.constant 0 : index
    %90 = vector.load %arg14[%c0_39, %c0_40] : memref<32x4xf32, #tpu.memory_space<vmem>>, vector<32x4xf32>
    %cst_41 = arith.constant dense<0.000000e+00> : vector<8x4xf32>
    %91 = tpu.matmul %89, %90, %cst_41 {dimension_numbers = #tpu.dot_dimension_numbers<[1], [0], [0], [1], [0, 0, 1, 1], [], []>} : vector<8x32xf32>, vector<32x4xf32>, vector<8x4xf32> -> vector<8x4xf32>
    %c0_42 = arith.constant 0 : index
    %c0_43 = arith.constant 0 : index
    %92 = vector.load %arg15[%c0_42, %c0_43] : memref<4x32xf32, #tpu.memory_space<vmem>>, vector<4x32xf32>
    %cst_44 = arith.constant dense<0.000000e+00> : vector<8x32xf32>
    %93 = tpu.matmul %91, %92, %cst_44 {dimension_numbers = #tpu.dot_dimension_numbers<[1], [0], [0], [1], [0, 0, 1, 1], [], []>} : vector<8x4xf32>, vector<4x32xf32>, vector<8x32xf32> -> vector<8x32xf32>
    %cst_45 = arith.constant 9.99999991E-38 : f32
    %94 = vector.broadcast %cst_45 : f32 to vector<8x32xf32>
    %95 = arith.maximumf %93, %94 : vector<8x32xf32>
    %96 = tpu.reciprocal %95 {approx = true} : vector<8x32xf32> -> vector<8x32xf32>
    %97 = arith.mulf %89, %96 : vector<8x32xf32>
    %98 = vector.shape_cast %81 : vector<8x32xf32> to vector<1x8x32xf32>
    %99 = vector.shape_cast %71 : vector<8x32xf32> to vector<1x8x32xf32>
    %100 = vector.shape_cast %84 : vector<8x32xf32> to vector<1x8x32xf32>
    %101 = vector.shape_cast %74 : vector<8x32xf32> to vector<1x8x32xf32>
    %cst_46 = arith.constant dense<0xFF800000> : vector<1x32xf32>
    %102 = vector.multi_reduction <maximumf>, %98, %cst_46 [1] : vector<1x8x32xf32> to vector<1x32xf32>
    %cst_47 = arith.constant dense<0xFF800000> : vector<1x32xf32>
    %103 = vector.multi_reduction <maximumf>, %99, %cst_47 [1] : vector<1x8x32xf32> to vector<1x32xf32>
    %104 = arith.maximumf %102, %103 : vector<1x32xf32>
    %105 = vector.shape_cast %104 : vector<1x32xf32> to vector<1x1x32xf32>
    %106 = vector.broadcast %105 : vector<1x1x32xf32> to vector<1x8x32xf32>
    %107 = arith.subf %98, %106 : vector<1x8x32xf32>
    %108 = math.exp %107 : vector<1x8x32xf32>
    %109 = vector.broadcast %105 : vector<1x1x32xf32> to vector<1x8x32xf32>
    %110 = arith.subf %99, %109 : vector<1x8x32xf32>
    %111 = math.exp %110 : vector<1x8x32xf32>
    %cst_48 = arith.constant dense<0.000000e+00> : vector<1x32xf32>
    %112 = vector.multi_reduction <add>, %108, %cst_48 [1] : vector<1x8x32xf32> to vector<1x32xf32>
    %cst_49 = arith.constant dense<0.000000e+00> : vector<1x32xf32>
    %113 = vector.multi_reduction <add>, %111, %cst_49 [1] : vector<1x8x32xf32> to vector<1x32xf32>
    %114 = arith.addf %112, %113 : vector<1x32xf32>
    %115 = tpu.reciprocal %114 {approx = true} : vector<1x32xf32> -> vector<1x32xf32>
    %116 = vector.shape_cast %115 : vector<1x32xf32> to vector<1x1x32xf32>
    %117 = vector.broadcast %116 : vector<1x1x32xf32> to vector<1x8x32xf32>
    %118 = arith.mulf %108, %117 : vector<1x8x32xf32>
    %119 = arith.truncf %118 : vector<1x8x32xf32> to vector<1x8x32xbf16>
    %120 = vector.broadcast %116 : vector<1x1x32xf32> to vector<1x8x32xf32>
    %121 = arith.mulf %111, %120 : vector<1x8x32xf32>
    %122 = arith.truncf %121 : vector<1x8x32xf32> to vector<1x8x32xbf16>
    %123 = arith.truncf %100 : vector<1x8x32xf32> to vector<1x8x32xbf16>
    "tpu.trace_start"() <{level = 10 : i32, message = "bnd,bnl->bdl"}> : () -> ()
    %cst_50 = arith.constant dense<0.000000e+00> : vector<1x32x32xf32>
    %124 = tpu.matmul %119, %123, %cst_50 {dimension_numbers = #tpu.dot_dimension_numbers<[1], [1], [2], [2], [0, 0, 0, 2, 1, 2], [0], [0]>} : vector<1x8x32xbf16>, vector<1x8x32xbf16>, vector<1x32x32xf32> -> vector<1x32x32xf32>
    "tpu.trace_stop"() : () -> ()
    %125 = arith.truncf %101 : vector<1x8x32xf32> to vector<1x8x32xbf16>
    "tpu.trace_start"() <{level = 10 : i32, message = "bnd,bnl->bdl"}> : () -> ()
    %cst_51 = arith.constant dense<0.000000e+00> : vector<1x32x32xf32>
    %126 = tpu.matmul %122, %125, %cst_51 {dimension_numbers = #tpu.dot_dimension_numbers<[1], [1], [2], [2], [0, 0, 0, 2, 1, 2], [0], [0]>} : vector<1x8x32xbf16>, vector<1x8x32xbf16>, vector<1x32x32xf32> -> vector<1x32x32xf32>
    "tpu.trace_stop"() : () -> ()
    %127 = arith.addf %124, %126 : vector<1x32x32xf32>
    %c0_52 = arith.constant 0 : index
    %c0_53 = arith.constant 0 : index
    %128 = vector.load %arg13[%c0_52, %c0_53] : memref<32x32xf32, #tpu.memory_space<vmem>>, vector<32x32xf32>
    %129 = vector.shape_cast %128 : vector<32x32xf32> to vector<1x32x32xf32>
    %130 = arith.mulf %127, %129 : vector<1x32x32xf32>
    %131 = arith.truncf %130 : vector<1x32x32xf32> to vector<1x32x32xbf16>
    %132 = arith.truncf %97 : vector<8x32xf32> to vector<8x32xbf16>
    %133 = vector.shape_cast %132 : vector<8x32xbf16> to vector<1x8x32xbf16>
    "tpu.trace_start"() <{level = 10 : i32, message = "btd,bdl->btl"}> : () -> ()
    %cst_54 = arith.constant dense<0.000000e+00> : vector<1x8x32xf32>
    %134 = tpu.matmul %133, %131, %cst_54 {dimension_numbers = #tpu.dot_dimension_numbers<[2], [1], [1], [2], [0, 0, 0, 1, 1, 2], [0], [0]>} : vector<1x8x32xbf16>, vector<1x32x32xbf16>, vector<1x8x32xf32> -> vector<1x8x32xf32>
    "tpu.trace_stop"() : () -> ()
    %135 = vector.shape_cast %134 : vector<1x8x32xf32> to vector<8x32xf32>
    %136 = arith.addf %0, %135 : vector<8x32xf32>
    %c0_55 = arith.constant 0 : index
    %c0_56 = arith.constant 0 : index
    %137 = vector.load %arg16[%c0_55, %c0_56] : memref<8x32xf32, #tpu.memory_space<vmem>>, vector<8x32xf32>
    tpu.vector_store %arg16[%c0_55, %c0_56], %136 {strides = array<i32>} : memref<8x32xf32, #tpu.memory_space<vmem>>, vector<8x32xf32>,
    return
  }
  func.func @transform_0(%arg0: i32) -> (i32, i32) {
    %c0_i32 = arith.constant 0 : i32
    %c0_i32_0 = arith.constant 0 : i32
    return %arg0, %c0_i32 : i32, i32
  }
  func.func @transform_1(%arg0: i32) -> (i32, i32) {
    %c0_i32 = arith.constant 0 : i32
    %c0_i32_0 = arith.constant 0 : i32
    return %arg0, %c0_i32 : i32, i32
  }
  func.func @transform_2(%arg0: i32) -> (i32, i32) {
    %c0_i32 = arith.constant 0 : i32
    %c0_i32_0 = arith.constant 0 : i32
    return %arg0, %c0_i32 : i32, i32
  }
  func.func @transform_3(%arg0: i32) -> (i32, i32) {
    %c0_i32 = arith.constant 0 : i32
    %c0_i32_0 = arith.constant 0 : i32
    return %arg0, %c0_i32 : i32, i32
  }
  func.func @transform_4(%arg0: i32) -> (i32, i32) {
    %c0_i32 = arith.constant 0 : i32
    %c0_i32_0 = arith.constant 0 : i32
    %c0_i32_1 = arith.constant 0 : i32
    return %c0_i32, %c0_i32_0 : i32, i32
  }
  func.func @transform_5(%arg0: i32) -> (i32, i32) {
    %c0_i32 = arith.constant 0 : i32
    %c0_i32_0 = arith.constant 0 : i32
    %c0_i32_1 = arith.constant 0 : i32
    return %c0_i32, %c0_i32_0 : i32, i32
  }
  func.func @transform_6(%arg0: i32) -> (i32, i32) {
    %c0_i32 = arith.constant 0 : i32
    %c0_i32_0 = arith.constant 0 : i32
    %c0_i32_1 = arith.constant 0 : i32
    return %c0_i32, %c0_i32_0 : i32, i32
  }
  func.func @transform_7(%arg0: i32) -> (i32, i32) {
    %c0_i32 = arith.constant 0 : i32
    %c0_i32_0 = arith.constant 0 : i32
    %c0_i32_1 = arith.constant 0 : i32
    return %c0_i32, %c0_i32_0 : i32, i32
  }
  func.func @transform_8(%arg0: i32) -> (i32, i32) {
    %c0_i32 = arith.constant 0 : i32
    %c0_i32_0 = arith.constant 0 : i32
    %c0_i32_1 = arith.constant 0 : i32
    return %c0_i32, %c0_i32_0 : i32, i32
  }
  func.func @transform_9(%arg0: i32) -> (i32, i32) {
    %c0_i32 = arith.constant 0 : i32
    %c0_i32_0 = arith.constant 0 : i32
    %c0_i32_1 = arith.constant 0 : i32
    return %c0_i32, %c0_i32_0 : i32, i32
  }
  func.func @transform_10(%arg0: i32) -> (i32, i32) {
    %c0_i32 = arith.constant 0 : i32
    %c0_i32_0 = arith.constant 0 : i32
    %c0_i32_1 = arith.constant 0 : i32
    return %c0_i32, %c0_i32_0 : i32, i32
  }
  func.func @transform_11(%arg0: i32) -> (i32, i32) {
    %c0_i32 = arith.constant 0 : i32
    %c0_i32_0 = arith.constant 0 : i32
    %c0_i32_1 = arith.constant 0 : i32
    return %c0_i32, %c0_i32_0 : i32, i32
  }
  func.func @transform_12(%arg0: i32) -> (i32, i32) {
    %c0_i32 = arith.constant 0 : i32
    %c0_i32_0 = arith.constant 0 : i32
    %c0_i32_1 = arith.constant 0 : i32
    return %c0_i32, %c0_i32_0 : i32, i32
  }
  func.func @transform_13(%arg0: i32) -> (i32, i32) {
    %c0_i32 = arith.constant 0 : i32
    %c0_i32_0 = arith.constant 0 : i32
    %c0_i32_1 = arith.constant 0 : i32
    return %c0_i32, %c0_i32_0 : i32, i32
  }
  func.func @transform_14(%arg0: i32) -> (i32, i32) {
    %c0_i32 = arith.constant 0 : i32
    %c0_i32_0 = arith.constant 0 : i32
    %c0_i32_1 = arith.constant 0 : i32
    return %c0_i32, %c0_i32_0 : i32, i32
  }
  func.func @transform_15(%arg0: i32) -> (i32, i32) {
    %c0_i32 = arith.constant 0 : i32
    %c0_i32_0 = arith.constant 0 : i32
    return %arg0, %c0_i32 : i32, i32
  }
}

</mosaic_0001>

<bundles_post_ra>
// kernel: tpu_custom_call.1
= control target key start
LH: loop header
LB: loop body
LE: loop exit
PB: predicated region body
PF: predicated region fallthrough
CT: control target
= control target key end

     0   :  { %s2358_s0 = inlined_call_operand.vmem [shape: f32[16,32], index: 0, kind: input, shape index: {}]   ;;  %s2359_s1 = inlined_call_operand.vmem [shape: f32[16,32], index: 1, kind: input, shape index: {}]   ;;  %s2360_s2 = inlined_call_operand.vmem [shape: f32[16,1], index: 2, kind: input, shape index: {}]   ;;  %s2361_s3 = inlined_call_operand.vmem [shape: f32[16,1], index: 3, kind: input, shape index: {}]   ;;  %s2362_s4 = inlined_call_operand.hbm [shape: f32[1,32], index: 4, kind: input, shape index: {}]   ;;  %s2363_s5 = inlined_call_operand.hbm [shape: f32[1,32], index: 5, kind: input, shape index: {}]   ;;  %s2364_s6 = inlined_call_operand.hbm [shape: f32[1,32], index: 6, kind: input, shape index: {}]   ;;  %s2365_s7 = inlined_call_operand.hbm [shape: f32[1,32], index: 7, kind: input, shape index: {}]   ;;  %s2366_s8 = inlined_call_operand.vmem [shape: bf16[32,96], index: 8, kind: input, shape index: {}]   ;;  %s2367_s9 = inlined_call_operand.hbm [shape: f32[1,96], index: 9, kind: input, shape index: {}]   ;;  %s2368_s10 = inlined_call_operand.vmem [shape: bf16[32,64], index: 10, kind: input, shape index: {}]   ;;  %s2369_s11 = inlined_call_operand.vmem [shape: f32[1,64], index: 11, kind: input, shape index: {}]   ;;  %s2370_s12 = inlined_call_operand.vmem [shape: f32[32,32], index: 12, kind: input, shape index: {}]   ;;  %s2371_s13 = inlined_call_operand.vmem [shape: f32[32,4], index: 13, kind: input, shape index: {}]   ;;  %s2372_s14 = inlined_call_operand.vmem [shape: f32[4,32], index: 14, kind: input, shape index: {}]   ;;  %s2373_s15 = inlined_call_operand.hbm [shape: f32[16,32], index: 15, kind: output, shape index: {}]  }
   0x1   :  { %2387 = sst [smem:[#allocation24_spill]] %s2363_s5 }
   0x2   :  { %2388 = sst [smem:[#allocation25_spill]] %s2373_s15 }
   0x3   :  { %20 = vsyncpa [#allocation3], 0 }
   0x4   :  { %21 = vsyncpa [#allocation6], 0 }
   0x5   :  { %22 = vsyncpa [#allocation9], 0 }
   0x6   :  { %23 = vsyncpa [#allocation4], 0 }
   0x7   :  { %25 = vsyncpa [#allocation4 + $0x1], 0  ;;  %s1993_s18 = smov 0   ;;  %s1995_s19 = smov 0  }
   0x8   :  { %s1997_s20 = smov 0   ;;  %s1999_s21 = smov 0  }
   0x9 LB: > { %2389 = sst [smem:[#allocation16_spill]] %s1886_s18  ;;  %s2014_s22 = sadd.s32 4294967295, %s1898_s21   ;;  %s1898_s21 = sphi %s1999_s21, %s2418_s21   ;;  %s1894_s20 = sphi %s1997_s20, %s2421_s20   ;;  %s1890_s19 = sphi %s1995_s19, %s2420_s19   ;;  %s1886_s18 = sphi %s1993_s18, %s2419_s18  }
   0xa   : > { %2390 = sst [smem:[#allocation17_spill]] %s1890_s19  ;;  %s1438_s23 = sadd.s32 4294967294, %s1898_s21  }
   0xb   : > { %2391 = sst [smem:[#allocation18_spill]] %s1894_s20  ;;  %s2018_s24 = sadd.s32 1, %s1898_s21  }
   0xc   : > { %2392 = sst [smem:[#allocation19_spill]] %s1898_s21  ;;  %s373_s25 = sadd.s32 1, %s1894_s20 }
   0xd   : > { %2393 = sst [smem:[#allocation20_spill]] %s2018_s24  ;;  %s370_s26 = ssub.s32 %s1898_s21, %s2018_s24 }
   0xe   : > { %p383_p0 = scmp.ne.s32.totalorder %s1894_s20, %s1890_s19  ;;  %p371_p1 = scmp.eq.s32.totalorder %s370_s26, 0 }
   0xf   : > { %p384_p2 = scmp.eq.s32.totalorder %s2014_s22, 1  ;;  %p389_p3 = scmp.ne.s32.totalorder %s1890_s19, %s1886_s18 }
  0x10   : > { %p390_p4 = scmp.eq.s32.totalorder %s1438_s23, 1  ;;  %p1439_p7 = scmp.ge.s32.totalorder %s1898_s21, 1 }
  0x11   : > { %s2029_s27 = scalar_select %p371_p1, %s1894_s20, %s373_s25  }
  0x12   : > { %p2031_p5 = por %p384_p2, %p383_p0  ;;  %p2035_p6 = por %p390_p4, %p389_p3 }
  0x13   : > { %2394 = sst [smem:[#allocation21_spill]] %s2029_s27  ;;  %p397_p8 = scmp.lt.s32.totalorder %s1898_s21, 3 }
  0x14   : > { %s2395_s28 = scalar_select %p2031_p5, 1, 0 }
  0x15   : > { %s2397_s29 = scalar_select %p2035_p6, 1, 0 }
  0x16   : > { %2396 = sst [smem:[#allocation22_spill]] %s2395_s28  ;;  %p2381_p9 = scmp.eq.s32.totalorder %s2014_s22, 0 }
  0x17   : > { %2398 = sst [smem:[#allocation23_spill]] %s2397_s29  ;;  %p2042_p10 = pnand %p1439_p7, %p397_p8 }
  0x18   : > { %s1900_s16 = smov [#allocation5]   ;;  %s1901_s23 = smov [#allocation8]  }
  0x19   : > { %s2399_s30 = scalar_select %p2042_p10, 1, 0 }
  0x1a   : > { %s421_s17 = sshll.u32 %s1900_s16, 4  ;;  %p1589_p11 = pneg %p2042_p10  ;;  %s422_s17 = int_to_ptr.vmem [resolvable:$true] %s421_s17 }
  0x1b   : > { %s443_s25 = sshll.u32 %s1901_s23, 4  ;;  %s1902_s27 = smov [#allocation2]   ;;  %s2054_s25 = int_to_ptr.vmem [resolvable:$true] %s443_s25 }
  0x1c   : > { %p2050_p12 = pnand %p2381_p9, %p1589_p11  ;;  %s410_s20 = sshll.u32 %s1902_s27, 4  ;;  %s2056_s20 = int_to_ptr.vmem [resolvable:$true] %s410_s20 }
  0x1d   : > { %s2401_s5 = sld [smem:[#allocation24_spill]] }
  0x1e   : > { %p2066_p0 = pneg %p2050_p12 }
  0x23   : > { %s1684_s16 = scalar_lea.hbm %s2401_s5, 16 }
  0x24   : > { %p1685_p13 = scmp.ne.s32.totalorder %s2401_s5, %s1684_s16  ;;  %p1691_p3 = scmp.lt.u32.totalorder %s1684_s16, %s2401_s5 }
  0x26   : > { %p1687_p1 = pnand %p2066_p0, %p1685_p13 }
  0x28   : > { %p1688_p2 = pneg %p1687_p1 }
  0x2a   : > { %p1693_p4 = pnand %p1691_p3, %p1688_p2 }
  0x2c   : > { %1696 = shalt.err (!%p1693_p4)
}
  0x2d   : > { %s1697_s24 = scalar_lea.vmem %s422_s17, 16  ;;  %s1704_s18 = scalar_lea.vmem %s422_s17, 32 }
  0x2e   : > { %p1698_p7 = scmp.ne.s32.totalorder %s422_s17, %s1697_s24  ;;  %p1705_p9 = scmp.lt.s32.totalorder %s422_s17, %s422_s17 }
  0x2f   : > { %p1706_p6 = scmp.lt.s32.totalorder %s1704_s18, %s1697_s24 }
  0x30   : > { %p1700_p8 = pnand %p1698_p7, %p2066_p0 }
  0x31   : > { %p1707_p5 = por %p1706_p6, %p1705_p9 }
  0x32   : > { %p1701_p11 = pneg %p1700_p8 }
  0x34   : > { %p1708_p10 = pnand %p1707_p5, %p1701_p11 }
  0x36   : > { %1711 = shalt.err (!%p1708_p10)
}
  0x37   : > { %1595 = dma.hbm_to_vmem [thread:$0]  (!%p2050_p12), %s2401_s5, 16, %s422_s17, [#allocation6]  }
  0x38   : > { %s1712_s27 = scalar_lea.hbm %s2365_s7, 16 }
  0x39   : > { %p1713_p13 = scmp.ne.s32.totalorder %s2365_s7, %s1712_s27  ;;  %p1719_p5 = scmp.lt.u32.totalorder %s1712_s27, %s2365_s7 }
  0x3b   : > { %p1715_p1 = pnand %p1713_p13, %p2066_p0 }
  0x3d   : > { %p1716_p6 = pneg %p1715_p1 }
  0x3f   : > { %p1721_p9 = pnand %p1719_p5, %p1716_p6 }
  0x41   : > { %1724 = shalt.err (!%p1721_p9)
}
  0x42   : > { %s1725_s17 = scalar_lea.vmem %s2054_s25, 16  ;;  %s1732_s19 = scalar_lea.vmem %s2054_s25, 32 }
  0x43   : > { %p1726_p10 = scmp.ne.s32.totalorder %s2054_s25, %s1725_s17  ;;  %p1733_p4 = scmp.lt.s32.totalorder %s2054_s25, %s2054_s25 }
  0x44   : > { %p1734_p7 = scmp.lt.s32.totalorder %s1732_s19, %s1725_s17 }
  0x45   : > { %p1728_p2 = pnand %p1726_p10, %p2066_p0 }
  0x46   : > { %p1735_p8 = por %p1734_p7, %p1733_p4 }
  0x47   : > { %p1729_p3 = pneg %p1728_p2 }
  0x49   : > { %p1736_p11 = pnand %p1735_p8, %p1729_p3 }
  0x4b   : > { %1739 = shalt.err (!%p1736_p11)
}
  0x4c   : > { %1601 = dma.hbm_to_vmem [thread:$0]  (!%p2050_p12), %s2365_s7, 16, %s2054_s25, [#allocation9]  }
  0x4d   : > { %s1740_s16 = scalar_lea.hbm %s2362_s4, 16 }
  0x4e   : > { %p1741_p13 = scmp.ne.s32.totalorder %s2362_s4, %s1740_s16  ;;  %p1747_p5 = scmp.lt.u32.totalorder %s1740_s16, %s2362_s4 }
  0x50   : > { %p1743_p1 = pnand %p1741_p13, %p2066_p0 }
  0x52   : > { %p1744_p6 = pneg %p1743_p1 }
  0x54   : > { %p1749_p9 = pnand %p1747_p5, %p1744_p6 }
  0x56   : > { %1752 = shalt.err (!%p1749_p9)
}
  0x57   : > { %s1753_s25 = scalar_lea.vmem %s2056_s20, 16  ;;  %s1760_s19 = scalar_lea.vmem %s2056_s20, 32 }
  0x58   : > { %p1754_p10 = scmp.ne.s32.totalorder %s2056_s20, %s1753_s25  ;;  %p1761_p4 = scmp.lt.s32.totalorder %s2056_s20, %s2056_s20 }
  0x59   : > { %p1762_p7 = scmp.lt.s32.totalorder %s1760_s19, %s1753_s25 }
  0x5a   : > { %p1756_p2 = pnand %p1754_p10, %p2066_p0 }
  0x5b   : > { %p1763_p8 = por %p1762_p7, %p1761_p4 }
  0x5c   : > { %p1757_p3 = pneg %p1756_p2 }
  0x5e   : > { %p1764_p11 = pnand %p1763_p8, %p1757_p3 }
  0x60   : > { %1767 = shalt.err (!%p1764_p11)
}
  0x61   : > { %1592 = dma.hbm_to_vmem [thread:$0]  (!%p2050_p12), %s2362_s4, 16, %s2056_s20, [#allocation3]  }
  0x62   : > { %s1903_s29 = smov [#allocation7]   ;;  %s1904_s16 = smov [#allocation10]  }
  0x63   : > { %s432_s15 = sshll.u32 %s1903_s29, 4  ;;  %s457_s27 = sshll.u32 %s1904_s16, 4  ;;  %s433_s15 = int_to_ptr.vmem [resolvable:$true] %s432_s15  ;;  %s458_s27 = int_to_ptr.vmem [resolvable:$true] %s457_s27 }
  0x64   : > { %s1768_s17 = scalar_lea.hbm %s2364_s6, 16 }
  0x65   : > { %p1769_p13 = scmp.ne.s32.totalorder %s2364_s6, %s1768_s17  ;;  %p1775_p5 = scmp.lt.u32.totalorder %s1768_s17, %s2364_s6 }
  0x67   : > { %p1771_p1 = pnand %p1769_p13, %p2066_p0 }
  0x69   : > { %p1772_p6 = pneg %p1771_p1 }
  0x6b   : > { %p1777_p9 = pnand %p1775_p5, %p1772_p6 }
  0x6d   : > { %1780 = shalt.err (!%p1777_p9)
}
  0x6e   : > { %s1781_s20 = scalar_lea.vmem %s433_s15, 16  ;;  %s1788_s21 = scalar_lea.vmem %s433_s15, 32 }
  0x6f   : > { %p1782_p10 = scmp.ne.s32.totalorder %s433_s15, %s1781_s20  ;;  %p1789_p4 = scmp.lt.s32.totalorder %s433_s15, %s433_s15 }
  0x70   : > { %p1790_p7 = scmp.lt.s32.totalorder %s1788_s21, %s1781_s20 }
  0x71   : > { %p1784_p2 = pnand %p1782_p10, %p2066_p0 }
  0x72   : > { %p1791_p8 = por %p1790_p7, %p1789_p4 }
  0x73   : > { %p1785_p3 = pneg %p1784_p2 }
  0x75   : > { %p1792_p11 = pnand %p1791_p8, %p1785_p3 }
  0x77   : > { %1795 = shalt.err (!%p1792_p11)
}
  0x78   : > { %1598 = dma.hbm_to_vmem [thread:$0]  (!%p2050_p12), %s2364_s6, 16, %s433_s15, [#allocation6]  }
  0x79   : > { %s1796_s18 = scalar_lea.hbm %s2367_s9, 16 }
  0x7a   : > { %p1797_p13 = scmp.ne.s32.totalorder %s2367_s9, %s1796_s18  ;;  %p1803_p5 = scmp.lt.u32.totalorder %s1796_s18, %s2367_s9 }
  0x7c   : > { %p1799_p1 = pnand %p1797_p13, %p2066_p0 }
  0x7e   : > { %p1800_p6 = pneg %p1799_p1 }
  0x80   : > { %p1805_p9 = pnand %p1803_p5, %p1800_p6 }
  0x82   : > { %1808 = shalt.err (!%p1805_p9)
}
  0x83   : > { %s1809_s20 = scalar_lea.vmem %s458_s27, 16  ;;  %s1816_s15 = scalar_lea.vmem %s458_s27, 32 }
  0x84   : > { %p1810_p10 = scmp.ne.s32.totalorder %s458_s27, %s1809_s20  ;;  %p1817_p4 = scmp.lt.s32.totalorder %s458_s27, %s458_s27 }
  0x85   : > { %p1818_p7 = scmp.lt.s32.totalorder %s1816_s15, %s1809_s20 }
  0x86   : > { %p1812_p2 = pnand %p1810_p10, %p2066_p0 }
  0x87   : > { %p1819_p8 = por %p1818_p7, %p1817_p4 }
  0x88   : > { %p1813_p3 = pneg %p1812_p2 }
  0x8a   : > { %p1820_p11 = pnand %p1819_p8, %p1813_p3 }
  0x8c   : > { %1823 = shalt.err (!%p1820_p11)
}
  0x8d   : > { %1604 = dma.hbm_to_vmem [thread:$0]  (!%p2050_p12), %s2367_s9, 16, %s458_s27, [#allocation9]  }
  0x8e   : > { %p2403_p13 = scmp.ne.s32.totalorder %s2399_s30, 0 }
  0x8f   : > { %p2404_p1 = scmp.eq.s32.totalorder (!%p2403_p13), %s2014_s22, 0 }
  0x90   : > { %513 = sbr.rel (%p2403_p13) target bundleno = 1909 (0x775), region = 80 }
  0x97   : > { %1869 = dma.done.wait (%p2404_p1), [#allocation3], 16   ;;  %p2405_p0 = pmov %p2404_p1 }
  0x99   : > { %1871 = vsyncadd (%p2405_p0), [#allocation3], 4294967280  ;;  %p2406_p6 = pmov %p2405_p0 }
  0x9a   : > { %p2407_p5 = pmov %p2405_p0 }
  0x9b   : > { %1873 = dma.done.wait (%p2406_p6), [#allocation6], 32  }
  0x9c   : > { %1875 = vsyncadd (%p2407_p5), [#allocation6], 4294967264  ;;  %p2408_p9 = pmov %p2405_p0 }
  0x9d   : > { %p2409_p12 = pmov %p2405_p0 }
  0x9e   : > { %1877 = dma.done.wait (%p2408_p9), [#allocation9], 32  }
  0x9f   : > { %1879 = vsyncadd (%p2409_p12), [#allocation9], 4294967264  ;;  %p588_p10 = scmp.lt.s32.totalorder %s2014_s22, 1  ;;  %vm611_vm0 = vcmask 261120   ;;  %v1666_v14 = vld [vmem:[%s2366_s8] sm:$0xff]   ;;  %v1905_v16 = vmov 0.0  }
  0xa0   : > { %v1668_v15 = vld [vmem:[%s2368_s10] sm:$0xff]   ;;  %1503 = vmatprep.subr.bf16.mxu0 %v1905_v16  ;;  %1511 = vmatprep.subr.bf16.mxu1 %v1905_v16  ;;  %v1667_v17 = vld [vmem:[%s2366_s8 + $0x8] sm:$0xff]   ;;  %vm1906_vm1 = vmmov 0   ;;  %v1907_v19 = vmov 0   ;;  %vm1003_vm2 = vcmask 523520   ;;  %s1909_s25 = smov 32  }
  0xa1   : > { %s589_s30 = scalar_select %p588_p10, %s2014_s22, 1  ;;  %1504 = vmatpush3.bf16.msra.mxu0 %v1666_v14  ;;  %1512 = vmatpush3.bf16.msra.mxu1 %v1668_v15  ;;  %v1669_v18 = vld [vmem:[%s2368_s10 + $0x8] sm:$0xff]   ;;  %v1457_v33 = vld [vmem:[#allocation2] ss:$0 sm:$0xff]  ;;  %v1458_v35 = vld [vmem:[#allocation5] ss:$0 sm:$0xff] }
  0xa2   : > { %1505 = vmatprep.subr.bf16.mxu0 %v1905_v16  ;;  %1507 = vmatprep.mubr.msk.bf16.mxu0 %vm1906_vm1, %v1905_v16  ;;  %v1459_v38 = vld [vmem:[#allocation7] ss:$0 sm:$0xff]  ;;  %v1460_v41 = vld [vmem:[#allocation8] ss:$0 sm:$0xff]  ;;  %v1461_v46 = vld [vmem:[#allocation10] ss:$0 sm:$0xff] }
  0xa3   : > { %s2182_s26 = sshll.u32 %s589_s30, 3  ;;  %1513 = vmatprep.subr.bf16.mxu1 %v1905_v16  ;;  %1515 = vmatprep.mubr.msk.bf16.mxu1 %vm1906_vm1, %v1905_v16  ;;  %vm919_vm3 = vcmask 1043456   ;;  %vm915_vm4 = vcmask 31744   ;;  %s1911_s5 = smov 64   ;;  %vm1087_vm5 = vcmask 64512  }
  0xa4   : > { %s591_s16 = scalar_lea.vmem %s2358_s0, %s2182_s26  ;;  %s595_s18 = scalar_lea.vmem %s2359_s1, %s2182_s26  ;;  %1664 = vset.pattern.permute.xlu0 %v1907_v19  ;;  %1665 = vset.pattern.permute.xlu1 %v1907_v19 }
  0xa5   : > { %v2192_v0 = vld [vmem:[%s591_s16] sm:$0xff]  ;;  %1506 = vmatpush3.bf16.msra.mxu0 %v1667_v17  ;;  %1514 = vmatpush3.bf16.msra.mxu1 %v1669_v18  ;;  %s599_s27 = scalar_lea.vmem %s2360_s2, %s2182_s26  ;;  %s603_s24 = scalar_lea.vmem %s2361_s3, %s2182_s26 }
  0xa6   : > { %v606_v1 = vld [vmem:[%s595_s18] sm:$0xff]  ;;  %v612_v2 = vsel %vm611_vm0, %v2192_v0, 0.0  ;;  %1530 = vmatprep.subr.mxu1 %v1905_v16  ;;  %s1908_s26 = smov 96   ;;  %s2410_s15 = sld [smem:[#allocation17_spill]] }
  0xa7   : > { %613 = vadd.xlane.f32.xlu0 %v612_v2  ;;  %v643_v3 = vsel %vm611_vm0, %v606_v1, 0.0  ;;  %v2229_v20 = vld [vmem:[%s599_s27] sm:$0xff]  ;;  %s2411_s29 = sld [smem:[#allocation22_spill]]  ;;  %s1478_s23 = sshll.u32 %s2014_s22, 7 }
  0xa8   : > { %v2231_v21 = vld [vmem:[%s603_s24] sm:$0xff]  ;;  %v803_v22 = vsub.f32 1.0, %v2229_v20 }
  0xa9   : > { %v817_v23 = vsub.f32 1.0, %v2231_v21  ;;  %v1465_v2 = vld [vmem:[%s2369_s11] ss:$0 sm:$0xff] }
  0xaa   : > { %v804_v24 = vmul.f32 -1000000.0, %v803_v22 }
  0xab   : > { %644 = vadd.xlane.f32.xlu0 %v643_v3  ;;  %v818_v25 = vmul.f32 -1000000.0, %v817_v23  ;;  %v837_v23 = vld [vmem:[%s2371_s13] sm:$0xff] }
  0xac   : > { %s585_s21 = sand.u32 1, %s2410_s15  }
  0xad   : > { %s1452_s30 = sshll.u32 %s585_s21, 3  ;;  %s1280_s22 = scalar_lea.sflag [#allocation4], %s585_s21 }
  0xae   : > { %s587_s27 = scalar_lea.vmem [#allocation11], %s1452_s30  ;;  %p2413_p3 = scmp.ne.s32.totalorder %s2411_s29, 0 }
  0xaf   : > { %s1293_s16 = sshll.u32 %s587_s27, 4  ;;  %s2317_s16 = int_to_ptr.vmem [resolvable:$true] %s1293_s16 }
  0xb0   : > { %s1824_s17 = scalar_lea.vmem %s2317_s16, 128 }
  0xb1   : > { %p1825_p2 = scmp.ne.s32.totalorder %s2317_s16, %s1824_s17 }
  0xb3   : > { %p1826_p4 = pnand %p1825_p2, %p2413_p3 }
  0xb5   : > { %p1827_p7 = pneg %p1826_p4 }
  0xc1   : > { %807 = vperm.xlu0 %1664, %v804_v24   ;;  %v838_v24 = vld [vmem:[%s2371_s13 + $0x8] sm:$0xff] }
 0x134   : > { %v614_v4 = vpop.xlane.xlu0 %613 }
 0x135   : > { %v616_v5 = vmul.f32 0.03125, %v614_v4 }
 0x137   : > { %v617_v6 = vsub.f32 %v2192_v0, %v616_v5 }
 0x138   : > { %v645_v7 = vpop.xlane.xlu0 %644 }
 0x139   : > { %v646_v8 = vmul.f32 0.03125, %v645_v7  ;;  %v618_v9 = vmul.f32 %v617_v6, %v617_v6 }
 0x13b   : > { %v647_v10 = vsub.f32 %v606_v1, %v646_v8  ;;  %v619_v11 = vsel %vm611_vm0, %v618_v9, 0.0 }
 0x13c   : > { %620 = vadd.xlane.f32.xlu1 %v619_v11  ;;  %v1016_v11 = vlaneseq }
 0x13d   : > { %v648_v12 = vmul.f32 %v647_v10, %v647_v10 }
 0x13f   : > { %v649_v13 = vsel %vm611_vm0, %v648_v12, 0.0 }
 0x140   : > { %650 = vadd.xlane.f32.xlu1 %v649_v13  ;;  %v808_v48 = vpop.permute.xlu0 %807  ;;  %v1017_v13 = vshrl.u32 %v1016_v11, 7 }
 0x142   : > { %v1018_v15 = vsub.s32 0, %v1017_v13 }
 0x151   : > { %821 = vperm.xlu1 %1665, %v818_v25   ;;  %v839_v25 = vld [vmem:[%s2371_s13 + $0x10] sm:$0xff] }
 0x1c9   : > { %v621_v26 = vpop.xlane.xlu1 %620 }
 0x1ca   : > { %v622_v27 = vmul.f32 0.03125, %v621_v26  ;;  %v1910_v26 = vmov 0.0|0.0  }
 0x1cb   : > { %1555 = vmatprep.subr.bf16.mxu0 %v1910_v26 }
 0x1cc   : > { %v623_v28 = vadd.f32 1e-05, %v622_v27  ;;  %v1556_v27 = vpack.c.bf16 %v838_v24, %v837_v23  ;;  %v1225_v24 = vld [vmem:[%s2370_s12 + $0x10] sm:$0xff] }
 0x1cd   : > { %v651_v29 = vpop.xlane.xlu1 %650 }
 0x1ce   : > { %1670 = vrsqrt.f32 %v623_v28  ;;  %v652_v30 = vmul.f32 0.03125, %v651_v29  ;;  %v840_v28 = vld [vmem:[%s2371_s13 + $0x18] sm:$0xff] }
 0x1cf   : > { %v1559_v29 = vpack.c.bf16 %v840_v28, %v839_v25  ;;  %v1226_v25 = vld [vmem:[%s2370_s12 + $0x18] sm:$0xff]  ;;  %v1224_v28 = vld [vmem:[%s2370_s12 + $0x8] sm:$0xff] }
 0x1d0   : > { %v653_v31 = vadd.f32 1e-05, %v652_v30 }
 0x1d1   : > { %v822_v4 = vpop.permute.xlu1 %821 }
 0x1d2   : > { %1672 = vrsqrt.f32 %v653_v31 }
 0x1d8   : > { %v1671_v32 = vpop.eup %1670 }
 0x1d9   : > { %v625_v34 = vmul.f32 %v1671_v32, %v617_v6 }
 0x1db   : > { %v632_v36 = vmul.f32 %v1457_v33, %v625_v34 }
 0x1dc   : > { %v1673_v37 = vpop.eup %1672 }
 0x1dd   : > { %v639_v39 = vadd.f32 %v1458_v35, %v632_v36  ;;  %v655_v40 = vmul.f32 %v1673_v37, %v647_v10 }
 0x1df   : > { %v640_v42 = vpack.c.bf16 %v639_v39, %v639_v39  ;;  %v662_v43 = vmul.f32 %v1459_v38, %v655_v40 }
 0x1e1   : > { %1508 = vmatmul.mubr.msk.bf16.vlgmr.msra.gmra.mrb[0].mxu0 %vm611_vm0, %v640_v42  ;;  %v669_v44 = vadd.f32 %v1460_v41, %v662_v43 }
 0x1e2   : > { %1527 = vmatprep.mubr.msk.f32.mxu0 %vm1906_vm1, %v1905_v16  ;;  %1557 = vmatpush3.bf16.msra.mxu0 %v1556_v27  ;;  %v1223_v27 = vld [vmem:[%s2370_s12] sm:$0xff] }
 0x1e3   : > { %v670_v45 = vpack.c.bf16 %v669_v44, %v669_v44  ;;  %1558 = vmatprep.subr.bf16.mxu0 %v1910_v26 }
 0x1e5   : > { %1516 = vmatmul.mubr.msk.bf16.vlgmr.msra.gmra.mrb[0].mxu1 %vm611_vm0, %v670_v45 }
 0x1e6   : > { %1532 = vmatprep.mubr.msk.f32.mxu1 %vm1906_vm1, %v1905_v16  ;;  %1560 = vmatpush3.bf16.msra.mxu0 %v1559_v29 }
 0x2b4   : > { %v731_v47 = vpop.f32.mrb[0].mxu0 }
 0x2b5   : > { %v2241_v49 = vadd.f32 %v1461_v46, %v731_v47  ;;  %v1509_v50 = vpop.f32.mrb[1].mxu0 }
 0x2b6   : > { %v734_v51 = vpop.f32.mrb[2].mxu0 }
 0x2b7   : > { %v810_v52 = vadd.f32 %v808_v48, %v2241_v49  ;;  %v1510_v53 = vpop.f32.mrb[3].mxu0  ;;  %v831_v22 = vsel %vm611_vm0, %v2241_v49, -inf }
 0x2b8   : > { %v797_v54 = vpop.f32.mrb[0].mxu1 }
 0x2b9   : > { %v1004_v55 = vsel %vm1003_vm2, %v810_v52, -inf  ;;  %v1517_v56 = vpop.f32.mrb[1].mxu1  ;;  %v2249_v3 = vadd.f32 %v1465_v2, %v797_v54 }
 0x2ba   : > { %v1005_v57 = vrot.slane %v1004_v55, 4  ;;  %v800_v58 = vpop.f32.mrb[2].mxu1 }
 0x2bb   : > { %v1518_v59 = vpop.f32.mrb[3].mxu1  ;;  %v824_v5 = vadd.f32 %v822_v4, %v2249_v3 }
 0x2bc   : > { %v1006_v60 = vmax.f32 %v1004_v55, %v1005_v57 }
 0x2bd   : > { %v996_v6 = vsel %vm611_vm0, %v824_v5, -inf }
 0x2be   : > { %v1007_v61 = vrot.slane %v1006_v60, 2  ;;  %v997_v7 = vrot.slane %v996_v6, 4 }
 0x2c0   : > { %v1008_v62 = vmax.f32 %v1006_v60, %v1007_v61  ;;  %v998_v8 = vmax.f32 %v996_v6, %v997_v7  ;;  %v914_v60 = vld [vmem:[%s2372_s14] sm:$0xf] }
 0x2c1   : > { %1531 = vmatpush3.msk.msra.mxu1 %vm919_vm3, %v914_v60 }
 0x2c2   : > { %v1009_v63 = vrot.slane %v1008_v62, 1  ;;  %v999_v9 = vrot.slane %v998_v8, 2  ;;  %1547 = vmatprep.subr.bf16.mxu1 %v1905_v16 }
 0x2c4   : > { %v1010_v1 = vmax.f32 %v1008_v62, %v1009_v63  ;;  %v1000_v10 = vmax.f32 %v998_v8, %v999_v9 }
 0x2c6   : > { %1012 = vrot.lane.b32.xlu1 %v1010_v1, %s1908_s26  ;;  %v1001_v12 = vrot.slane %v1000_v10, 1 }
 0x2c8   : > { %v1002_v14 = vmax.f32 %v1000_v10, %v1001_v12 }
 0x338   : > { %v1013_v17 = vpop.permute.xlu1 %1012 }
 0x339   : > { %v1015_v18 = vmax.f32 %v1002_v14, %v1013_v17 }
 0x33b   : > { %v1019_v19 = vrot.slane %v1015_v18, %v1018_v15 }
 0x33d   : > { %1024 = vrot.lane.b32.xlu1 %v1019_v19, %s1909_s25  ;;  %v1020_v45 = vsub.f32 %v824_v5, %v1019_v19 }
 0x33f   : > { %v1021_v46 = vmul.f32 1.442695, %v1020_v45 }
 0x361   : > { %832 = vmax.xlane.f32.xlu1 %v831_v22 }
 0x3af   : > { %v1025_v30 = vpop.permute.xlu1 %1024 }
 0x3b0   : > { %v1027_v31 = vsub.f32 %v810_v52, %v1025_v30 }
 0x3b2   : > { %v1028_v32 = vmul.f32 1.442695, %v1027_v31 }
 0x3b4   : > { %1674 = vpow2.f32 %v1028_v32 }
 0x3be   : > { %v1675_v33 = vpop.eup %1674 }
 0x3bf   : > { %v1037_v34 = vsel %vm1003_vm2, %v1675_v33, 0.0 }
 0x3c0   : > { %v1038_v35 = vrot.slane %v1037_v34, 4 }
 0x3c2   : > { %v1039_v36 = vadd.f32 %v1038_v35, %v1037_v34 }
 0x3c4   : > { %v1040_v37 = vrot.slane %v1039_v36, 2 }
 0x3c6   : > { %v1041_v38 = vadd.f32 %v1040_v37, %v1039_v36 }
 0x3c8   : > { %v1042_v39 = vrot.slane %v1041_v38, 1 }
 0x3ca   : > { %v1043_v40 = vadd.f32 %v1042_v39, %v1041_v38 }
 0x3cc   : > { %1045 = vrot.lane.b32.xlu0 %v1043_v40, %s1908_s26 }
 0x3ee   : > { %v833_v41 = vpop.xlane.xlu1 %832 }
 0x3ef   : > { %v834_v42 = vsub.f32 %v2241_v49, %v833_v41 }
 0x3f1   : > { %v835_v43 = vmul.f32 1.442695, %v834_v42 }
 0x3f3   : > { %1676 = vpow2.f32 %v835_v43 }
 0x3f4   : > { %1678 = vpow2.f32 %v1021_v46 }
 0x3fd   : > { %v2271_v44 = vpop.eup %1676 }
 0x3fe   : > { %1528 = vmatmul.mubr.msk.f32.vlgmr.msra.gmra.mrb[4].mxu0 %vm611_vm0, %v2271_v44  ;;  %v1679_v47 = vpop.eup %1678 }
 0x3ff   : > { %v1030_v48 = vsel %vm611_vm0, %v1679_v47, 0.0 }
 0x400   : > { %v1031_v50 = vrot.slane %v1030_v48, 4 }
 0x402   : > { %v1032_v51 = vadd.f32 %v1031_v50, %v1030_v48 }
 0x404   : > { %v1033_v52 = vrot.slane %v1032_v51, 2 }
 0x406   : > { %v1034_v53 = vadd.f32 %v1033_v52, %v1032_v51 }
 0x408   : > { %v1035_v54 = vrot.slane %v1034_v53, 1 }
 0x40a   : > { %v1036_v55 = vadd.f32 %v1035_v54, %v1034_v53 }
 0x43e   : > { %v1046_v56 = vpop.permute.xlu0 %1045 }
 0x43f   : > { %v1048_v57 = vadd.f32 %v1046_v56, %v1036_v55 }
 0x441   : > { %1680 = vrcp.f32 %v1048_v57 }
 0x44b   : > { %v1681_v58 = vpop.eup %1680 }
 0x44c   : > { %v1053_v59 = vrot.slane %v1681_v58, %v1018_v15 }
 0x44e   : > { %1057 = vrot.lane.b32.xlu0 %v1053_v59, %s1909_s25  ;;  %v1054_v8 = vmul.f32 %v1679_v47, %v1053_v59  ;;  %s1912_s25 = smov [#allocation11]  }
 0x44f   : > { %s1828_s19 = sshll.u32 %s1912_s25, 4  ;;  %s1829_s19 = int_to_ptr.vmem [resolvable:$false] %s1828_s19 }
 0x450   : > { %v1055_v9 = vpack.c.bf16 %v1054_v8, %v1054_v8  ;;  %s1830_s28 = scalar_lea.vmem %s1829_s19, 256  ;;  %p1831_p8 = scmp.lt.s32.totalorder %s2317_s16, %s1829_s19 }
 0x451   : > { %p1832_p11 = scmp.lt.s32.totalorder %s1830_s28, %s1824_s17 }
 0x452   : > { %813 = vperm.xlu0 %1664, %v2229_v20  }
 0x453   : > { %p1833_p13 = por %p1832_p11, %p1831_p8 }
 0x455   : > { %p1834_p1 = pnand %p1833_p13, %p1827_p7 }
 0x456   : > { %827 = vperm.xlu0 %1664, %v2231_v21  }
 0x4c0   : > { %v1058_v61 = vpop.permute.xlu0 %1057 }
 0x4c1   : > { %v1060_v62 = vmul.f32 %v1675_v33, %v1058_v61 }
 0x4c3   : > { %v1061_v63 = vpack.c.bf16 %v1060_v62, %v1060_v62 }
 0x4c5   : > { %1065 = vrot.lane.b32.xlu0 %v1061_v63, %s1908_s26 }
 0x4d1   : > { %v910_v1 = vpop.f32.mrb[4].mxu0  ;;  %v814_v2 = vpop.permute.xlu0 %813 }
 0x4d2   : > { %v816_v4 = vmul.f32 %v814_v2, %v2241_v49  ;;  %v1529_v5 = vpop.f32.mrb[5].mxu0  ;;  %1533 = vmatmul.mubr.msk.f32.vlgmr.msra.gmra.mrb[4].mxu1 %vm915_vm4, %v910_v1 }
 0x4d3   : > { %1551 = vmatprep.mubr.msk.bf16.mxu1 %vm1906_vm1, %v1905_v16 }
 0x4d4   : > { %v1063_v20 = vpack.c.bf16 %v816_v4, %v816_v4 }
 0x4d5   : > { %v828_v6 = vpop.permute.xlu0 %827 }
 0x4d6   : > { %v830_v7 = vmul.f32 %v828_v6, %v2249_v3  ;;  %1085 = vrot.lane.b32.xlu1 %v1063_v20, %s1911_s5 }
 0x4d8   : > { %v1062_v21 = vpack.c.bf16 %v830_v7, %v830_v7 }
 0x4da   : > { %1163 = vrot.lane.b32.xlu0 %v1062_v21, %s1908_s26  ;;  %s2412_s26 = sld [smem:[#allocation25_spill]] }
 0x4e0   : > { %s2315_s18 = scalar_lea.hbm %s2412_s26, %s1478_s23 }
 0x4f9   : > { %1146 = vxpose.xlu1.c.b16.start.end [1/1] (short) (narrow) %v1055_v9, 32 }
 0x537   : > { %v1066_v10 = vpop.permute.xlu0 %1065 }
 0x538   : > { %1068 = vxpose.xlu0.c.b16.start.end [1/1] (short) (narrow) %v1066_v10, 32 }
 0x548   : > { %v1086_v49 = vpop.permute.xlu1 %1085 }
 0x549   : > { %v1095_v11 = vsel %vm919_vm3, %v1086_v49, 0  ;;  %1565 = vmatprep.subr.msk.bf16.mxu0 %vm919_vm3, %v1086_v49 }
 0x54a   : > { %1536 = vmatpush3.bf16.msra.mxu0 %v1095_v11 }
 0x54c   : > { %v1164_v12 = vpop.permute.xlu0 %1163 }
 0x54d   : > { %1566 = vmatprep.subr.msk.bf16.mxu0 %vm919_vm3, %v1164_v12  ;;  %v1172_v15 = vsel %vm919_vm3, %v1164_v12, 0 }
 0x55f   : > { %v1154_v13 = vpop.trf.xlu1 }
 0x563   : > { %v1155_v19 = vpop.trf.xlu1 }
 0x59e   : > { %v1076_v3 = vpop.trf.xlu0 }
 0x59f   : > { %1537 = vmatprep.mubr.msk.bf16.mxu0 %vm1087_vm5, %v1076_v3 }
 0x5a2   : > { %v1077_v14 = vpop.trf.xlu0 }
 0x5a3   : > { %1538 = vmatmul.mubr.msk.bf16.vlgmr.msra.gmra.mrb[8].mxu0 %vm1087_vm5, %v1077_v14 }
 0x5a4   : > { %1542 = vmatpush3.bf16.msra.mxu0 %v1172_v15  ;;  %1543 = vmatprep.mubr.msk.bf16.mxu0 %vm1087_vm5, %v1154_v13 }
 0x5a5   : > { %v989_v17 = vpop.f32.mrb[4].mxu1 }
 0x5a6   : > { %v1534_v18 = vpop.f32.mrb[5].mxu1  ;;  %v993_v22 = vmax.f32 %v989_v17, 1e-37 }
 0x5a8   : > { %1682 = vrcp.f32 %v993_v22 }
 0x5af   : > { %1544 = vmatmul.mubr.msk.bf16.vlgmr.msra.gmra.mrb[8].mxu0 %vm1087_vm5, %v1155_v19 }
 0x5b2   : > { %v1683_v36 = vpop.eup %1682 }
 0x5b3   : > { %v995_v38 = vmul.f32 %v1683_v36, %v2271_v44 }
 0x5b5   : > { %v1233_v39 = vpack.c.bf16 %v995_v38, %v995_v38 }
 0x682   : > { %v1545_v23 = vpop.f32.mrb[8].mxu0 }
 0x683   : > { %v1208_v26 = vpop.f32.mrb[9].mxu0  ;;  %v1229_v30 = vmul.f32 %v1545_v23, %v1225_v24 }
 0x684   : > { %v1546_v29 = vpop.f32.mrb[10].mxu0  ;;  %v1227_v33 = vmul.f32 %v1223_v27, %v1208_v26 }
 0x685   : > { %v1230_v31 = vmul.f32 %v1546_v29, %v1226_v25  ;;  %v1211_v32 = vpop.f32.mrb[11].mxu0 }
 0x686   : > { %v1228_v34 = vmul.f32 %v1224_v28, %v1211_v32 }
 0x687   : > { %v1232_v35 = vpack.c.bf16 %v1230_v31, %v1229_v30 }
 0x688   : > { %v1231_v37 = vpack.c.bf16 %v1228_v34, %v1227_v33 }
 0x68a   : > { %1548 = vmatpush3.bf16.msra.mxu1 %v1231_v37 }
 0x68b   : > { %1549 = vmatprep.subr.bf16.mxu1 %v1905_v16 }
 0x68e   : > { %1550 = vmatpush3.bf16.msra.mxu1 %v1232_v35 }
 0x691   : > { %1552 = vmatmul.mubr.msk.bf16.vlgmr.msra.gmra.mrb[8].mxu1 %vm611_vm0, %v1233_v39 }
 0x764   : > { %v1271_v40 = vpop.f32.mrb[8].mxu1 }
 0x765   : > { %v1277_v41 = vadd.f32 %v1271_v40, %v2192_v0  ;;  %v1553_v42 = vpop.f32.mrb[9].mxu1 }
 0x766   : > { %v1274_v16 = vpop.f32.mrb[10].mxu1 }
 0x767   : > { %v1554_v43 = vpop.f32.mrb[11].mxu1  ;;  %1278 = vst.msk [vmem:[%s587_s27] sm:$0xff] %vm611_vm0, %v1277_v41 }
 0x768   : > { %1837 = shalt.err (!%p1834_p1)
}
 0x769   : > { %s1838_s20 = scalar_lea.hbm %s2315_s18, 128  ;;  %s1842_s30 = scalar_lea.hbm %s2412_s26, 256 }
 0x76a   : > { %p1839_p0 = scmp.ne.s32.totalorder %s2315_s18, %s1838_s20  ;;  %p1843_p9 = scmp.lt.u32.totalorder %s2315_s18, %s2412_s26 }
 0x76b   : > { %p1844_p12 = scmp.lt.u32.totalorder %s1842_s30, %s1838_s20  ;;  %p1846_p2 = scmp.lt.u32.totalorder %s1838_s20, %s2315_s18 }
 0x76c   : > { %p1840_p6 = pnand %p1839_p0, %p2413_p3 }
 0x76d   : > { %p1845_p10 = por %p1844_p12, %p1843_p9 }
 0x76e   : > { %p1841_p5 = pneg %p1840_p6 }
 0x76f   : > { %p1847_p4 = por %p1846_p2, %p1845_p10 }
 0x771   : > { %p1848_p7 = pnand %p1847_p4, %p1841_p5 }
 0x773   : > { %1851 = shalt.err (!%p1848_p7)
}
 0x774   : > { %1587 = dma.vmem_to_hbm [thread:$0]  (%p2413_p3), %s2317_s16, 128, %s2315_s18, %s1280_s22  }
 0x775 PF: > { %s2414_s5 = sld [smem:[#allocation19_spill]]  ;;  %s2415_s24 = sld [smem:[#allocation16_spill]] }
 0x776   : > { %s2416_s17 = sld [smem:[#allocation23_spill]] }
 0x77b   : > { %p1619_p8 = scmp.ge.s32.totalorder %s2414_s5, 2  ;;  %s1305_s25 = sand.u32 1, %s2415_s24  }
 0x77c   : > { %p2417_p11 = scmp.ne.s32.totalorder %s2416_s17, 0  ;;  %s1306_s19 = scalar_lea.sflag [#allocation4], %s1305_s25 }
 0x77e   : > { %p1606_p13 = pnand %p1619_p8, %p2417_p11 }
 0x780   : > { %1881 = dma.done.wait (!%p1606_p13), %s1306_s19, 128  }
 0x781   : > { %1883 = vsyncadd (!%p1606_p13), %s1306_s19, 4294967168  ;;  %s2418_s21 = sld [smem:[#allocation20_spill]]  ;;  %s2419_s18 = sld [smem:[#allocation17_spill]] }
 0x782   : > { %s2420_s19 = sld [smem:[#allocation18_spill]]  ;;  %s2421_s20 = sld [smem:[#allocation21_spill]] }
 0x787   : > { %p28_p1 = scmp.ge.s32.totalorder %s2418_s21, 4  }
 0x789   :  { %30 = sbr.rel (!%p28_p1) target bundleno = 9 (0x9), region = 145 }
 0x790   :  { %1311 = vsyncpa [#allocation3], 1 }
 0x791   :  { %1313 = vsyncpa [#allocation3 + $0x1], 1 }
 0x792   :  { %1314 = vsyncpa [#allocation6], 1 }
 0x793   :  { %1315 = vsyncpa [#allocation9], 1 }
 0x794   :  { %1316 = vsyncpa [#allocation4], 1 }
 0x795   :  { %1318 = vsyncpa [#allocation4 + $0x1], 1 }

</bundles_post_ra>
